<compile_context>
chip_gen: v5e
topology: v5e:2x2
jax: 0.10.0
libtpu: 0.0.40
codegen_flags: <defaults>
</compile_context>

<pallas_src>
import functools
import math

import numpy as np
import jax
import jax.numpy as jnp
from jax import lax
from jax.experimental import pallas as pl
from jax.experimental.pallas import tpu as pltpu


def _round_up(x, m):
    return (x + m - 1) // m * m


def _lifted_loss_kernel(score_ref, trow_ref, trowk_ref, tcoli_ref, mag_ref,
                        out_ref, f_acc,
                        *, margin, tm, tk, b_real, matmul_dtype):
    i = pl.program_id(0)          # anchor-tile index   (parallel axis)
    k = pl.program_id(1)          # k-reduction index   (arbitrary axis)
    nk = pl.num_programs(1)

    bp = score_ref.shape[0]       # padded batch
    i0 = pl.multiple_of(i * tm, tm)
    k0 = pl.multiple_of(k * tk, tk)

    @pl.when(k == 0)
    def _init():
        f_acc[...] = jnp.zeros_like(f_acc)

    score = score_ref[...]        # (Bp, D) f32, resident across the grid
    mag_row = mag_ref[...]        # (1, Bp)  ||s_j||^2 (wrapper-computed)

    # ---- X rows for this k-tile:  X[k0+r, j] = exp(-dist(k0+r, j)) ---------
    s_k = score_ref[pl.ds(k0, tk), :]                                # (tk, D)
    sim_k = lax.dot_general(s_k, score, (((1,), (1,)), ((), ())),
                            preferred_element_type=jnp.float32)      # (tk, Bp)
    row_k = lax.broadcasted_iota(jnp.int32, (tk, bp), 0)
    col_k = lax.broadcasted_iota(jnp.int32, (tk, bp), 1)
    # ||s_{k0+r}||^2 is sim_k's (shifted) diagonal — no extra s*s reduce.
    mag_k = jnp.sum(jnp.where(col_k == k0 + row_k, sim_k, 0.0),
                    axis=1, keepdims=True)                           # (tk, 1)
    d2_k = mag_k + mag_row - 2.0 * sim_k
    # exp(margin) is factored out of X and added back inside the log below;
    # mathematically identical to the reference, but cannot overflow for
    # large margins.
    x_k = jnp.exp(-jnp.sqrt(jnp.maximum(d2_k, 0.0)))                 # (tk, Bp)

    # ---- F[i-tile, :] += other(i-tile, k-tile) @ X(k-tile, :) --------------
    t_anchor = tcoli_ref[...]     # (tm, 1) labels of this anchor tile
    t_ktile = trowk_ref[...]      # (1, tk) labels of this k tile
    kk = k0 + lax.broadcasted_iota(jnp.int32, (tm, tk), 1)
    other_blk = jnp.where(
        jnp.logical_and(t_anchor != t_ktile, kk < b_real), 1.0, 0.0)
    f_acc[...] += jnp.dot(other_blk.astype(matmul_dtype),
                          x_k.astype(matmul_dtype),
                          preferred_element_type=jnp.float32)        # (tm, Bp)

    # ---- finalize this anchor tile on the last k step ----------------------
    @pl.when(k == nk - 1)
    def _finalize():
        s_i = score_ref[pl.ds(i0, tm), :]                            # (tm, D)
        sim_i = lax.dot_general(s_i, score, (((1,), (1,)), ((), ())),
                                preferred_element_type=jnp.float32)  # (tm, Bp)
        row_i = lax.broadcasted_iota(jnp.int32, (tm, bp), 0)
        col_i = lax.broadcasted_iota(jnp.int32, (tm, bp), 1)
        eq_i = col_i == i0 + row_i          # column j == anchor's own index
        mag_i = jnp.sum(jnp.where(eq_i, sim_i, 0.0), axis=1, keepdims=True)
        d2_i = mag_i + mag_row - 2.0 * sim_i
        dist_i = jnp.sqrt(jnp.maximum(d2_i, 0.0))                    # l_p

        f = f_acc[...]
        l_ni = jnp.sum(jnp.where(eq_i, f, 0.0), axis=1, keepdims=True)
        # NOTE: an anchor with no negatives gives l_ni + f == 0, log(0) = -inf,
        # and relu(-inf + l_p) == 0 — this matches the torch reference.
        l_n = margin + jnp.log(l_ni + f)
        v = jnp.maximum(l_n + dist_i, 0.0)

        trow = trow_ref[...]                # (1, Bp) all labels
        valid = jnp.logical_and(col_i < b_real, i0 + row_i < b_real)
        same = jnp.logical_and(
            jnp.logical_and(t_anchor == trow, jnp.logical_not(eq_i)), valid)
        partial = jnp.sum(jnp.where(same, v * v, 0.0))
        # Lane/sublane-safe partial-loss block (wrapper reads [0, 0]).
        out_ref[...] = jnp.full(out_ref.shape, partial, jnp.float32)


def lifted_loss(score, targets, margin=1.0, *, block_m=256, block_k=256,
                matmul_dtype=jnp.bfloat16):
    """JAX/Pallas equivalent of LiftedLoss.forward(score, targets=targets)."""
    score = jnp.asarray(score, jnp.float32)
    targets = jnp.asarray(targets, jnp.int32)
    b, d = score.shape

    # ---- tile / padding choice ---------------------------------------------
    b8 = _round_up(b, 8)
    if b8 <= block_m and b8 <= block_k:
        tm = tk = bp = b8                   # single tile in both directions
    else:
        # When the batch is actually split, keep tiles 128-lane aligned so the
        # (1, tk) label block and the in-kernel slices stay layout-friendly.
        tm = _round_up(min(block_m, b8), 128)
        tk = _round_up(min(block_k, b8), 128)
        bp = _round_up(b8, math.lcm(tm, tk))
        tm, tk = min(tm, bp), min(tk, bp)

    pad = bp - b
    if pad:
        score_p = jnp.pad(score, ((0, pad), (0, 0)))
        targets_p = jnp.concatenate(
            [targets, jnp.full((pad,), -1, jnp.int32)])
    else:
        score_p, targets_p = score, targets

    trow = targets_p.reshape(1, bp)
    tcol = targets_p.reshape(bp, 1)
    mag_row = jnp.sum(score_p * score_p, axis=1).reshape(1, bp)

    ni, nk = bp // tm, bp // tk

    # VMEM budget: resident score + label/mag rows + F accumulator + in-flight
    # (tile x Bp) temporaries, with slack for double buffering.
    est = (2 * bp * d * 4 + 8 * bp * 4 + tm * bp * 4
           + 12 * max(tm, tk) * bp * 4 + 4 * 8 * 128 * 4 + (2 << 20))
    vmem_limit = int(min(max(est, 32 * 1024 * 1024), 64 * 1024 * 1024))

    kernel = functools.partial(
        _lifted_loss_kernel, margin=float(margin), tm=tm, tk=tk,
        b_real=b, matmul_dtype=matmul_dtype)

    partials = pl.pallas_call(
        kernel,
        out_shape=jax.ShapeDtypeStruct((ni * 8, 128), jnp.float32),
        grid_spec=pltpu.PrefetchScalarGridSpec(
            num_scalar_prefetch=0,
            grid=(ni, nk),
            in_specs=[
                pl.BlockSpec((bp, d), lambda i, k: (0, 0)),   # score (resident)
                pl.BlockSpec((1, bp), lambda i, k: (0, 0)),   # labels, full row
                pl.BlockSpec((1, tk), lambda i, k: (0, k)),   # labels, k-tile
                pl.BlockSpec((tm, 1), lambda i, k: (i, 0)),   # labels, anchor col
                pl.BlockSpec((1, bp), lambda i, k: (0, 0)),   # ||s||^2 row
            ],
            out_specs=pl.BlockSpec((8, 128), lambda i, k: (i, 0)),
            scratch_shapes=[pltpu.VMEM((tm, bp), jnp.float32)],
        ),
        compiler_params=pltpu.CompilerParams(
            dimension_semantics=("parallel", "arbitrary"),
            vmem_limit_bytes=vmem_limit),
    )(score_p, trow, trow, tcol, mag_row)

    total = jnp.sum(partials[0::8, 0])

    # counter depends only on the labels -> compute it in the wrapper.
    cnt = jnp.sum((targets[:, None] == targets[None, :]).astype(jnp.float32)) - b
    # TODO(synk): the torch module prints 'Panic!' and returns python 0 when no
    # positive pairs exist; here we return 0.0 via a select with a NaN-safe
    # denominator (so a future grad through this path stays finite).
    return jnp.where(cnt > 0.0,
                     total / (4.0 * jnp.maximum(cnt, 1.0)),
                     jnp.float32(0.0))


def _reference_lifted_loss(score, target, margin=1.0):
    """Literal NumPy translation of the PyTorch forward (for validation)."""
    score = np.asarray(score, np.float32)
    target = np.asarray(target)
    bsz = score.shape[0]
    mag = (score ** 2).sum(1)
    sim = score @ score.T
    dist = mag[None, :] + mag[:, None] - 2.0 * sim
    dist = np.sqrt(np.maximum(dist, 0.0))
    loss = 0.0
    counter = 0
    for i in range(bsz):
        t = target[i]
        same = (target == t).copy()
        same[i] = False
        other = target != t
        l_nj = np.exp(margin - dist[same][:, other]).sum(1)
        l_ni = np.exp(margin - dist[i][other]).sum()
        l_n = np.log(l_ni + l_nj)
        l_p = dist[i, same]
        loss += (np.maximum(l_n + l_p, 0.0) ** 2).sum()
        counter += int(same.sum())
    if counter == 0:
        return 0.0
    return loss / (2 * counter) / 2


if __name__ == "__main__":
    key = jax.random.PRNGKey(0)
    k1, k2 = jax.random.split(key)

    # Case 1: tiny batch, single tile (grid (1, 1)).
    score1 = jax.random.normal(k1, (8, 32), dtype=jnp.float32)
    targets1 = jnp.array([0, 0, 1, 1, 2, 2, 3, 3], dtype=jnp.int32)
    ref1 = _reference_lifted_loss(np.asarray(score1), np.asarray(targets1), 1.0)

    out1_f32 = jax.block_until_ready(
        lifted_loss(score1, targets1, margin=1.0, matmul_dtype=jnp.float32))
    np.testing.assert_allclose(np.asarray(out1_f32), ref1, rtol=5e-4, atol=1e-5)

    out1_bf16 = jax.block_until_ready(lifted_loss(score1, targets1, margin=1.0))
    np.testing.assert_allclose(np.asarray(out1_bf16), ref1, rtol=2e-2, atol=1e-4)

    # Case 2: batch that does not divide the tile -> padded, tiled grid (2, 2)
    # with a real k-reduction and megacore-parallel anchor tiles.
    score2 = jax.random.normal(k2, (160, 32), dtype=jnp.float32)
    targets2 = jax.random.randint(jax.random.PRNGKey(1), (160,), 0, 16,
                                  dtype=jnp.int32)
    ref2 = _reference_lifted_loss(np.asarray(score2), np.asarray(targets2), 1.0)

    out2_f32 = jax.block_until_ready(
        lifted_loss(score2, targets2, margin=1.0, block_m=128, block_k=128,
                    matmul_dtype=jnp.float32))
    np.testing.assert_allclose(np.asarray(out2_f32), ref2, rtol=5e-4, atol=1e-5)

    out2_bf16 = jax.block_until_ready(
        lifted_loss(score2, targets2, margin=1.0, block_m=128, block_k=128))
    np.testing.assert_allclose(np.asarray(out2_bf16), ref2, rtol=2e-2, atol=1e-4)

    # Case 3: no positive pairs -> loss is exactly 0 (torch prints 'Panic!').
    targets3 = jnp.arange(8, dtype=jnp.int32)
    out3 = jax.block_until_ready(lifted_loss(score1, targets3, margin=1.0))
    assert float(out3) == 0.0

    print("KERNEL_OK")
</pallas_src>

<mosaic_0001>
module attributes {stable_mosaic.version = 11 : i64} {
  func.func @_lifted_loss_kernel(%arg0: i32, %arg1: i32, %arg2: memref<8x32xf32, #tpu.memory_space<vmem>>, %arg3: memref<1x8xi32, #tpu.memory_space<vmem>>, %arg4: memref<1x8xi32, #tpu.memory_space<vmem>>, %arg5: memref<8x1xi32, #tpu.memory_space<vmem>>, %arg6: memref<1x8xf32, #tpu.memory_space<vmem>>, %arg7: memref<8x128xf32, #tpu.memory_space<vmem>>, %arg8: memref<8x8xf32, #tpu.memory_space<vmem>>) attributes {dimension_semantics = [#tpu.dimension_semantics<parallel>, #tpu.dimension_semantics<arbitrary>], iteration_bounds = array<i64: 1, 1>, scalar_prefetch = 0 : i64, scratch_operands = 1 : i64, tpu.core_type = #tpu.core_type<tc>, window_params = [{pipeline_mode = #tpu.pipeline_mode<synchronous>, transform_indices = @transform_0, window_bounds = array<i64: 8, 32>}, {pipeline_mode = #tpu.pipeline_mode<synchronous>, transform_indices = @transform_1, window_bounds = array<i64: 1, 8>}, {transform_indices = @transform_2, window_bounds = array<i64: 1, 8>}, {transform_indices = @transform_3, window_bounds = array<i64: 8, 1>}, {pipeline_mode = #tpu.pipeline_mode<synchronous>, transform_indices = @transform_4, window_bounds = array<i64: 1, 8>}, {transform_indices = @transform_5, window_bounds = array<i64: 8, 128>}]} {
    %c8_i32 = arith.constant 8 : i32
    %0 = arith.muli %arg0, %c8_i32 : i32
    %1 = tpu.assume_multiple %0, 8 : i32
    %c8_i32_0 = arith.constant 8 : i32
    %2 = arith.muli %arg1, %c8_i32_0 : i32
    %3 = tpu.assume_multiple %2, 8 : i32
    %c0_i32 = arith.constant 0 : i32
    %4 = arith.cmpi eq, %arg1, %c0_i32 : i32
    %5 = arith.extui %4 : i1 to i32
    %c0_i32_1 = arith.constant 0 : i32
    %6 = arith.cmpi ne, %5, %c0_i32_1 : i32
    scf.if %6 {
      %cst_25 = arith.constant 0.000000e+00 : f32
      %54 = vector.broadcast %cst_25 : f32 to vector<8x8xf32>
      %c0_26 = arith.constant 0 : index
      %c0_27 = arith.constant 0 : index
      %55 = vector.load %arg8[%c0_26, %c0_27] : memref<8x8xf32, #tpu.memory_space<vmem>>, vector<8x8xf32>
      tpu.vector_store %arg8[%c0_26, %c0_27], %54 {strides = array<i32>} : memref<8x8xf32, #tpu.memory_space<vmem>>, vector<8x8xf32>,
    } else {
    }
    %c0 = arith.constant 0 : index
    %c0_2 = arith.constant 0 : index
    %7 = vector.load %arg2[%c0, %c0_2] : memref<8x32xf32, #tpu.memory_space<vmem>>, vector<8x32xf32>
    %c0_3 = arith.constant 0 : index
    %c0_4 = arith.constant 0 : index
    %8 = vector.load %arg6[%c0_3, %c0_4] : memref<1x8xf32, #tpu.memory_space<vmem>>, vector<1x8xf32>
    %9 = arith.index_cast %3 : i32 to index
    %c0_5 = arith.constant 0 : index
    %10 = vector.load %arg2[%9, %c0_5] : memref<8x32xf32, #tpu.memory_space<vmem>>, vector<8x32xf32>
    %cst = arith.constant dense<0.000000e+00> : vector<8x8xf32>
    %11 = tpu.matmul %10, %7, %cst {dimension_numbers = #tpu.dot_dimension_numbers<[1], [1], [0], [0], [0, 0, 1, 0], [], []>} : vector<8x32xf32>, vector<8x32xf32>, vector<8x8xf32> -> vector<8x8xf32>
    %12 = tpu.iota {dimensions = array<i32: 0>} : vector<8x8xi32>
    %13 = tpu.iota {dimensions = array<i32: 1>} : vector<8x8xi32>
    %14 = vector.broadcast %3 : i32 to vector<8x8xi32>
    %15 = arith.addi %14, %12 : vector<8x8xi32>
    %16 = arith.cmpi eq, %13, %15 : vector<8x8xi32>
    %cst_6 = arith.constant 0.000000e+00 : f32
    %17 = vector.broadcast %cst_6 : f32 to vector<8x8xf32>
    %18 = arith.select %16, %11, %17 : vector<8x8xi1>, vector<8x8xf32>
    %cst_7 = arith.constant dense<0.000000e+00> : vector<8xf32>
    %19 = vector.multi_reduction <add>, %18, %cst_7 [1] : vector<8x8xf32> to vector<8xf32>
    %20 = vector.shape_cast %19 : vector<8xf32> to vector<8x1xf32>
    %21 = vector.broadcast %20 : vector<8x1xf32> to vector<8x8xf32>
    %22 = vector.broadcast %8 : vector<1x8xf32> to vector<8x8xf32>
    %23 = arith.addf %21, %22 : vector<8x8xf32>
    %cst_8 = arith.constant 2.000000e+00 : f32
    %24 = vector.broadcast %cst_8 : f32 to vector<8x8xf32>
    %25 = arith.mulf %24, %11 : vector<8x8xf32>
    %26 = arith.subf %23, %25 : vector<8x8xf32>
    %cst_9 = arith.constant 0.000000e+00 : f32
    %27 = vector.broadcast %cst_9 : f32 to vector<8x8xf32>
    %28 = arith.maximumf %26, %27 : vector<8x8xf32>
    %29 = math.sqrt %28 : vector<8x8xf32>
    %cst_10 = arith.constant 0.000000e+00 : f32
    %30 = vector.broadcast %cst_10 : f32 to vector<8x8xf32>
    %31 = arith.subf %30, %29 : vector<8x8xf32>
    %32 = math.exp %31 : vector<8x8xf32>
    %c0_11 = arith.constant 0 : index
    %c0_12 = arith.constant 0 : index
    %33 = vector.load %arg5[%c0_11, %c0_12] : memref<8x1xi32, #tpu.memory_space<vmem>>, vector<8x1xi32>
    %c0_13 = arith.constant 0 : index
    %c0_14 = arith.constant 0 : index
    %34 = vector.load %arg4[%c0_13, %c0_14] : memref<1x8xi32, #tpu.memory_space<vmem>>, vector<1x8xi32>
    %35 = tpu.iota {dimensions = array<i32: 1>} : vector<8x8xi32>
    %36 = vector.broadcast %3 : i32 to vector<8x8xi32>
    %37 = arith.addi %36, %35 : vector<8x8xi32>
    %38 = vector.broadcast %33 : vector<8x1xi32> to vector<8x8xi32>
    %39 = vector.broadcast %34 : vector<1x8xi32> to vector<8x8xi32>
    %40 = arith.cmpi ne, %38, %39 : vector<8x8xi32>
    %c8_i32_15 = arith.constant 8 : i32
    %41 = vector.broadcast %c8_i32_15 : i32 to vector<8x8xi32>
    %42 = arith.cmpi slt, %37, %41 : vector<8x8xi32>
    %43 = arith.andi %40, %42 : vector<8x8xi1>
    %cst_16 = arith.constant 1.000000e+00 : f32
    %cst_17 = arith.constant 0.000000e+00 : f32
    %44 = vector.broadcast %cst_16 : f32 to vector<8x8xf32>
    %45 = vector.broadcast %cst_17 : f32 to vector<8x8xf32>
    %46 = arith.select %43, %44, %45 : vector<8x8xi1>, vector<8x8xf32>
    %c0_18 = arith.constant 0 : index
    %c0_19 = arith.constant 0 : index
    %47 = vector.load %arg8[%c0_18, %c0_19] : memref<8x8xf32, #tpu.memory_space<vmem>>, vector<8x8xf32>
    %cst_20 = arith.constant dense<0.000000e+00> : vector<8x8xf32>
    %48 = tpu.matmul %46, %32, %cst_20 {dimension_numbers = #tpu.dot_dimension_numbers<[1], [0], [0], [1], [0, 0, 1, 1], [], []>} : vector<8x8xf32>, vector<8x8xf32>, vector<8x8xf32> -> vector<8x8xf32>
    %49 = arith.addf %47, %48 : vector<8x8xf32>
    %c0_21 = arith.constant 0 : index
    %c0_22 = arith.constant 0 : index
    %50 = vector.load %arg8[%c0_21, %c0_22] : memref<8x8xf32, #tpu.memory_space<vmem>>, vector<8x8xf32>
    tpu.vector_store %arg8[%c0_21, %c0_22], %49 {strides = array<i32>} : memref<8x8xf32, #tpu.memory_space<vmem>>, vector<8x8xf32>,
    %c0_i32_23 = arith.constant 0 : i32
    %51 = arith.cmpi eq, %arg1, %c0_i32_23 : i32
    %52 = arith.extui %51 : i1 to i32
    %c0_i32_24 = arith.constant 0 : i32
    %53 = arith.cmpi ne, %52, %c0_i32_24 : i32
    scf.if %53 {
      %54 = arith.index_cast %1 : i32 to index
      %c0_25 = arith.constant 0 : index
      %55 = vector.load %arg2[%54, %c0_25] : memref<8x32xf32, #tpu.memory_space<vmem>>, vector<8x32xf32>
      %cst_26 = arith.constant dense<0.000000e+00> : vector<8x8xf32>
      %56 = tpu.matmul %55, %7, %cst_26 {dimension_numbers = #tpu.dot_dimension_numbers<[1], [1], [0], [0], [0, 0, 1, 0], [], []>} : vector<8x32xf32>, vector<8x32xf32>, vector<8x8xf32> -> vector<8x8xf32>
      %57 = tpu.iota {dimensions = array<i32: 0>} : vector<8x8xi32>
      %58 = tpu.iota {dimensions = array<i32: 1>} : vector<8x8xi32>
      %59 = vector.broadcast %1 : i32 to vector<8x8xi32>
      %60 = arith.addi %59, %57 : vector<8x8xi32>
      %61 = arith.cmpi eq, %58, %60 : vector<8x8xi32>
      %cst_27 = arith.constant 0.000000e+00 : f32
      %62 = vector.broadcast %cst_27 : f32 to vector<8x8xf32>
      %63 = arith.select %61, %56, %62 : vector<8x8xi1>, vector<8x8xf32>
      %cst_28 = arith.constant dense<0.000000e+00> : vector<8xf32>
      %64 = vector.multi_reduction <add>, %63, %cst_28 [1] : vector<8x8xf32> to vector<8xf32>
      %65 = vector.shape_cast %64 : vector<8xf32> to vector<8x1xf32>
      %66 = vector.broadcast %65 : vector<8x1xf32> to vector<8x8xf32>
      %67 = vector.broadcast %8 : vector<1x8xf32> to vector<8x8xf32>
      %68 = arith.addf %66, %67 : vector<8x8xf32>
      %cst_29 = arith.constant 2.000000e+00 : f32
      %69 = vector.broadcast %cst_29 : f32 to vector<8x8xf32>
      %70 = arith.mulf %69, %56 : vector<8x8xf32>
      %71 = arith.subf %68, %70 : vector<8x8xf32>
      %cst_30 = arith.constant 0.000000e+00 : f32
      %72 = vector.broadcast %cst_30 : f32 to vector<8x8xf32>
      %73 = arith.maximumf %71, %72 : vector<8x8xf32>
      %74 = math.sqrt %73 : vector<8x8xf32>
      %c0_31 = arith.constant 0 : index
      %c0_32 = arith.constant 0 : index
      %75 = vector.load %arg8[%c0_31, %c0_32] : memref<8x8xf32, #tpu.memory_space<vmem>>, vector<8x8xf32>
      %cst_33 = arith.constant 0.000000e+00 : f32
      %76 = vector.broadcast %cst_33 : f32 to vector<8x8xf32>
      %77 = arith.select %61, %75, %76 : vector<8x8xi1>, vector<8x8xf32>
      %cst_34 = arith.constant dense<0.000000e+00> : vector<8xf32>
      %78 = vector.multi_reduction <add>, %77, %cst_34 [1] : vector<8x8xf32> to vector<8xf32>
      %79 = vector.shape_cast %78 : vector<8xf32> to vector<8x1xf32>
      %80 = vector.broadcast %79 : vector<8x1xf32> to vector<8x8xf32>
      %81 = arith.addf %80, %75 : vector<8x8xf32>
      %82 = math.log %81 : vector<8x8xf32>
      %cst_35 = arith.constant 1.000000e+00 : f32
      %83 = vector.broadcast %cst_35 : f32 to vector<8x8xf32>
      %84 = arith.addf %83, %82 : vector<8x8xf32>
      %85 = arith.addf %84, %74 : vector<8x8xf32>
      %cst_36 = arith.constant 0.000000e+00 : f32
      %86 = vector.broadcast %cst_36 : f32 to vector<8x8xf32>
      %87 = arith.maximumf %85, %86 : vector<8x8xf32>
      %c0_37 = arith.constant 0 : index
      %c0_38 = arith.constant 0 : index
      %88 = vector.load %arg3[%c0_37, %c0_38] : memref<1x8xi32, #tpu.memory_space<vmem>>, vector<1x8xi32>
      %c8_i32_39 = arith.constant 8 : i32
      %89 = vector.broadcast %c8_i32_39 : i32 to vector<8x8xi32>
      %90 = arith.cmpi slt, %58, %89 : vector<8x8xi32>
      %91 = vector.broadcast %1 : i32 to vector<8x8xi32>
      %92 = arith.addi %91, %57 : vector<8x8xi32>
      %c8_i32_40 = arith.constant 8 : i32
      %93 = vector.broadcast %c8_i32_40 : i32 to vector<8x8xi32>
      %94 = arith.cmpi slt, %92, %93 : vector<8x8xi32>
      %95 = arith.andi %90, %94 : vector<8x8xi1>
      %96 = vector.broadcast %33 : vector<8x1xi32> to vector<8x8xi32>
      %97 = vector.broadcast %88 : vector<1x8xi32> to vector<8x8xi32>
      %98 = arith.cmpi eq, %96, %97 : vector<8x8xi32>
      %cst_41 = arith.constant dense<true> : vector<8x8xi1>
      %99 = arith.xori %61, %cst_41 : vector<8x8xi1>
      %100 = arith.andi %98, %99 : vector<8x8xi1>
      %101 = arith.andi %100, %95 : vector<8x8xi1>
      %102 = arith.mulf %87, %87 : vector<8x8xf32>
      %cst_42 = arith.constant 0.000000e+00 : f32
      %103 = vector.broadcast %cst_42 : f32 to vector<8x8xf32>
      %104 = arith.select %101, %102, %103 : vector<8x8xi1>, vector<8x8xf32>
      %105 = vector.shape_cast %104 : vector<8x8xf32> to vector<1x8x8xf32>
      %cst_43 = arith.constant dense<0.000000e+00> : vector<1xf32>
      %106 = vector.multi_reduction <add>, %105, %cst_43 [1, 2] : vector<1x8x8xf32> to vector<1xf32>
      %107 = vector.shape_cast %106 : vector<1xf32> to vector<1x1x1xf32>
      %108 = vector.extract %107[0, 0, 0] : f32 from vector<1x1x1xf32>
      %109 = vector.broadcast %108 : f32 to vector<8x128xf32>
      %c0_44 = arith.constant 0 : index
      %c0_45 = arith.constant 0 : index
      %110 = vector.load %arg7[%c0_44, %c0_45] : memref<8x128xf32, #tpu.memory_space<vmem>>, vector<8x128xf32>
      tpu.vector_store %arg7[%c0_44, %c0_45], %109 {strides = array<i32>} : memref<8x128xf32, #tpu.memory_space<vmem>>, vector<8x128xf32>,
    } else {
    }
    return
  }
  func.func @transform_0(%arg0: i32, %arg1: i32) -> (i32, i32) {
    %c0_i32 = arith.constant 0 : i32
    %c0_i32_0 = arith.constant 0 : i32
    %c0_i32_1 = arith.constant 0 : i32
    return %c0_i32, %c0_i32_0 : i32, i32
  }
  func.func @transform_1(%arg0: i32, %arg1: i32) -> (i32, i32) {
    %c0_i32 = arith.constant 0 : i32
    %c0_i32_0 = arith.constant 0 : i32
    %c0_i32_1 = arith.constant 0 : i32
    return %c0_i32, %c0_i32_0 : i32, i32
  }
  func.func @transform_2(%arg0: i32, %arg1: i32) -> (i32, i32) {
    %c0_i32 = arith.constant 0 : i32
    %c0_i32_0 = arith.constant 0 : i32
    return %c0_i32, %arg1 : i32, i32
  }
  func.func @transform_3(%arg0: i32, %arg1: i32) -> (i32, i32) {
    %c0_i32 = arith.constant 0 : i32
    %c0_i32_0 = arith.constant 0 : i32
    return %arg0, %c0_i32 : i32, i32
  }
  func.func @transform_4(%arg0: i32, %arg1: i32) -> (i32, i32) {
    %c0_i32 = arith.constant 0 : i32
    %c0_i32_0 = arith.constant 0 : i32
    %c0_i32_1 = arith.constant 0 : i32
    return %c0_i32, %c0_i32_0 : i32, i32
  }
  func.func @transform_5(%arg0: i32, %arg1: i32) -> (i32, i32) {
    %c0_i32 = arith.constant 0 : i32
    %c0_i32_0 = arith.constant 0 : i32
    return %arg0, %c0_i32 : i32, i32
  }
}

</mosaic_0001>

<bundles_post_ra>
// kernel: tpu_custom_call.1
= control target key start
LH: loop header
LB: loop body
LE: loop exit
PB: predicated region body
PF: predicated region fallthrough
CT: control target
= control target key end

     0   :  { %10 = vsyncpa [#allocation4], 0  ;;  %s395_s0 = inlined_call_operand.vmem [shape: f32[8,32], index: 0, kind: input, shape index: {}]   ;;  %s396_s1 = inlined_call_operand.vmem [shape: s32[1,8], index: 1, kind: input, shape index: {}]   ;;  %s397_s2 = inlined_call_operand.hbm [shape: s32[1,8], index: 2, kind: input, shape index: {}]   ;;  %s398_s3 = inlined_call_operand.vmem [shape: s32[8,1], index: 3, kind: input, shape index: {}]   ;;  %s399_s4 = inlined_call_operand.vmem [shape: f32[1,8], index: 4, kind: input, shape index: {}]   ;;  %s400_s5 = inlined_call_operand.hbm [shape: f32[8,128], index: 5, kind: output, shape index: {}]  }
   0x1   :  { %11 = vsyncpa [#allocation5], 0  ;;  %s21_s20 = sshll.u32 %s397_s2, 4  ;;  %s323_s21 = smov [#allocation3]   ;;  %s22_s20 = int_to_ptr.hbm [resolvable:$true] %s21_s20 }
   0x2   :  { %s23_s22 = sshll.u32 %s323_s21, 4  ;;  %s24_s22 = int_to_ptr.vmem [resolvable:$true] %s23_s22 }
   0x3   :  { %26 = dma.hbm_to_vmem [thread:$0]  %s22_s20, 16, %s24_s22, [#allocation4]  }
   0x4   :  { %319 = dma.done.wait [#allocation4], 16  }
   0x5   :  { %320 = vsyncadd [#allocation4], 4294967280  ;;  %vm47_vm0 = vcmask 261120   ;;  %v43_v0 = vld [vmem:[%s395_s0] sm:$0xff]  ;;  %v324_v1 = vmov 0   ;;  %v74_v2 = vlaneseq  ;;  %vm41_vm2 = vcmask 64512  }
   0x6   :  { %247 = vmatpush.xpose.msk.msra.mxu0 %vm47_vm0, %v43_v0  ;;  %250 = vmatpush.xpose.msk.msra.mxu2 %vm47_vm0, %v43_v0  ;;  %v108_v8 = vld [vmem:[%s398_s3] sm:$0xff]  ;;  %v325_v18 = vmov 0.0   ;;  %vm326_vm3 = vmmov 1   ;;  %v261_v31 = vld [vmem:[#allocation3] ss:$0 sm:$0xff]  ;;  %s237_s30 = sshll.u32 %s400_s5, 4  ;;  %s238_s30 = int_to_ptr.hbm [resolvable:$true] %s237_s30 }
   0x7   :  { %259 = vset.pattern.permute.xlu0 %v324_v1  ;;  %v75_v3 = vshrl.u32 %v74_v2, 7  ;;  %v77_v4 = vand.u32 127, %v74_v2  ;;  %v260_v12 = vld [vmem:[%s399_s4] ss:$0 sm:$0xff]  ;;  %42 = vst.msk [vmem:[#allocation2] sm:$0xff] %vm41_vm2, %v325_v18 }
   0x8   :  { %v262_v21 = vld [vmem:[%s396_s1] ss:$0 sm:$0xff]  ;;  %s327_s1 = smov [#allocation6]  }
   0x9   :  { %248 = vmatmul.msk.f32.vlgmr.msra.gmra.mxu0 %vm47_vm0, %v43_v0  ;;  %251 = vmatmul.msk.f32.vlgmr.msra.gmra.mxu2 %vm47_vm0, %v43_v0  ;;  %vm80_vm1 = vcmp.eq.s32.totalorder %v77_v4, %v75_v3  ;;  %vm116_vm5 = vcmp.lt.s32.totalorder %v77_v4, 8  ;;  %s235_s4 = sshll.u32 %s327_s1, 4  ;;  %s236_s4 = int_to_ptr.vmem [resolvable:$true] %s235_s4 }
   0xa   :  { %vm213_vm4 = vmxor %vm80_vm1, %vm326_vm3 }
   0xe   :  { %v119_v37 = vld [vmem:[#allocation2] sm:$0xff] }
  0x86   :  { %v71_v5 = vpop.f32.mrf.mxu0 }
  0x87   :  { %v81_v6 = vsel %vm80_vm1, %v71_v5, 0.0  ;;  %v90_v14 = vmul.f32 2.0, %v71_v5 }
  0x88   :  { %v83_v7 = vsel %vm41_vm2, %v81_v6, 0.0 }
  0x89   :  { %84 = vadd.xlane.f32.xlu0 %v83_v7 }
  0x8c   :  { %v170_v9 = vpop.f32.mrf.mxu2 }
  0x8d   :  { %v176_v10 = vsel %vm80_vm1, %v170_v9, 0.0  ;;  %v181_v44 = vmul.f32 2.0, %v170_v9 }
  0x8e   :  { %v177_v11 = vsel %vm41_vm2, %v176_v10, 0.0 }
  0x8f   :  { %178 = vadd.xlane.f32.xlu1 %v177_v11 }
  0x9d   :  { %112 = vperm.xlu0 %259, %v108_v8  }
  0xfc   :  { %v85_v13 = vpop.xlane.xlu0 %84 }
  0xfd   :  { %v89_v15 = vadd.f32 %v260_v12, %v85_v13 }
  0xff   :  { %v91_v16 = vsub.f32 %v89_v15, %v90_v14 }
 0x101   :  { %v92_v17 = vmax.f32 %v91_v16, 0.0 }
 0x102   :  { %v179_v43 = vpop.xlane.xlu1 %178 }
 0x103   :  { %263 = vrsqrt.f32 %v92_v17  ;;  %vm100_vm9 = vcmp.eq.f32.partialorder %v92_v17, inf  ;;  %v103_v29 = vand.u32 2147483648, %v92_v17  ;;  %vm102_vm10 = vcmp.eq.f32.partialorder %v92_v17, 0.0 }
 0x104   :  { %v180_v45 = vadd.f32 %v260_v12, %v179_v43 }
 0x106   :  { %v182_v46 = vsub.f32 %v180_v45, %v181_v44 }
 0x108   :  { %v183_v47 = vmax.f32 %v182_v46, 0.0 }
 0x109   :  { %v264_v19 = vpop.eup %263 }
 0x10a   :  { %v94_v20 = vmul.f32 %v264_v19, %v92_v17  ;;  %vm191_vm13 = vcmp.eq.f32.partialorder %v183_v47, inf  ;;  %v194_v58 = vand.u32 2147483648, %v183_v47  ;;  %vm193_vm14 = vcmp.eq.f32.partialorder %v183_v47, 0.0 }
 0x10c   :  { %v95_v22 = vmul.f32 %v264_v19, %v94_v20 }
 0x10e   :  { %v96_v23 = vmul.f32 0.5, %v95_v22 }
 0x10f   :  { %v113_v24 = vpop.permute.xlu0 %112 }
 0x110   :  { %vm212_vm6 = vcmp.eq.s32.totalorder %v113_v24, %v262_v21  ;;  %v97_v25 = vsub.f32 1.5, %v96_v23  ;;  %vm115_vm11 = vcmp.ne.s32.totalorder %v113_v24, %v261_v31 }
 0x111   :  { %vm214_vm7 = vmand %vm212_vm6, %vm213_vm4 }
 0x112   :  { %v98_v26 = vmul.f32 %v264_v19, %v97_v25  ;;  %vm380_vm8 = vmand %vm214_vm7, %vm116_vm5 }
 0x113   :  { %vm117_vm12 = vmand %vm115_vm11, %vm116_vm5 }
 0x114   :  { %v99_v28 = vmul.f32 %v98_v26, %v92_v17  ;;  %v118_v35 = vsel %vm117_vm12, 1.0, %v325_v18 }
 0x116   :  { %v101_v30 = vsel %vm100_vm9, %v92_v17, %v99_v28 }
 0x117   :  { %v104_v32 = vsel %vm102_vm10, %v103_v29, %v101_v30 }
 0x118   :  { %v105_v33 = vsub.f32 0.0, %v104_v32 }
 0x11a   :  { %v106_v34 = vmul.f32 1.442695, %v105_v33 }
 0x11c   :  { %265 = vpow2.f32 %v106_v34 }
 0x11d   :  { %267 = vrsqrt.f32 %v183_v47 }
 0x122   :  { %v266_v36 = vpop.eup %265 }
 0x123   :  { %138 = vmatpush.msra.mxu1 %v266_v36  ;;  %v268_v48 = vpop.eup %267 }
 0x124   :  { %249 = vmatmul.msk.f32.vlgmr.msra.gmra.mxu1 %vm41_vm2, %v118_v35  ;;  %v185_v49 = vmul.f32 %v268_v48, %v183_v47 }
 0x126   :  { %v186_v50 = vmul.f32 %v268_v48, %v185_v49 }
 0x128   :  { %v187_v51 = vmul.f32 0.5, %v186_v50 }
 0x12a   :  { %v188_v52 = vsub.f32 1.5, %v187_v51 }
 0x12c   :  { %v189_v55 = vmul.f32 %v268_v48, %v188_v52 }
 0x12e   :  { %v190_v56 = vmul.f32 %v189_v55, %v183_v47 }
 0x130   :  { %v192_v60 = vsel %vm191_vm13, %v183_v47, %v190_v56 }
 0x131   :  { %v195_v62 = vsel %vm193_vm14, %v194_v58, %v192_v60 }
 0x1a1   :  { %v140_v38 = vpop.f32.mrf.mxu1 }
 0x1a2   :  { %v143_v39 = vadd.f32 %v140_v38, %v119_v37 }
 0x1a4   :  { %144 = vst.msk [vmem:[#allocation2] sm:$0xff] %vm41_vm2, %v143_v39 }
 0x1ab   :  { %v196_v40 = vld [vmem:[#allocation2] sm:$0xff] }
 0x1ac   :  { %v197_v41 = vsel %vm80_vm1, %v196_v40, 0.0 }
 0x1ad   :  { %v198_v42 = vsel %vm41_vm2, %v197_v41, 0.0 }
 0x1ae   :  { %199 = vadd.xlane.f32.xlu1 %v198_v42 }
 0x221   :  { %v200_v53 = vpop.xlane.xlu1 %199 }
 0x222   :  { %v201_v54 = vadd.f32 %v200_v53, %v196_v40 }
 0x224   :  { %269 = vlog2.f32 %v201_v54 }
 0x22a   :  { %v270_v57 = vpop.eup %269 }
 0x22b   :  { %v203_v59 = vmul.f32 0.6931472, %v270_v57 }
 0x22d   :  { %v204_v61 = vadd.f32 1.0, %v203_v59 }
 0x22f   :  { %v205_v63 = vadd.f32 %v204_v61, %v195_v62 }
 0x231   :  { %v206_v0 = vmax.f32 %v205_v63, 0.0 }
 0x233   :  { %v216_v1 = vmul.f32 %v206_v0, %v206_v0 }
 0x235   :  { %v217_v2 = vsel %vm380_vm8, %v216_v1, 0.0 }
 0x236   :  { %v218_v3 = vsel %vm41_vm2, %v217_v2, 0.0 }
 0x237   :  { %219 = vadd.xlane.f32.xlu2 %v218_v3 }
 0x2aa   :  { %v220_v4 = vpop.xlane.xlu2 %219 }
 0x2ab   :  { %v221_v5 = vrot.slane %v220_v4, 4 }
 0x2ad   :  { %v222_v6 = vadd.f32 %v221_v5, %v220_v4 }
 0x2af   :  { %v223_v7 = vrot.slane %v222_v6, 2 }
 0x2b1   :  { %v224_v8 = vadd.f32 %v223_v7, %v222_v6 }
 0x2b3   :  { %v225_v9 = vrot.slane %v224_v8, 1 }
 0x2b5   :  { %v226_v10 = vadd.f32 %v225_v9, %v224_v8 }
 0x2b7   :  { %252 = vpush %v226_v10 }
 0x2e8   :  { %s253_s6 = spop %252 }
 0x2e9   :  { %v228_v11 = vstv %s253_s6 }
 0x2ea   :  { %229 = vst [vmem:[#allocation6] sm:$0xff] %v228_v11 }
 0x2eb   :  { %240 = dma.vmem_to_hbm [thread:$0]  %s236_s4, 128, %s238_s30, [#allocation5]  }
 0x2ec   :  { %321 = dma.done.wait [#allocation5], 128  }
 0x2ed   :  { %322 = vsyncadd [#allocation5], 4294967168 }
 0x2ee   :  { %245 = vsyncpa [#allocation4], 1 }
 0x2ef   :  { %246 = vsyncpa [#allocation5], 1 }

</bundles_post_ra>
